<compile_context>
chip_gen: v5e
topology: v5e:2x2
jax: 0.10.0
libtpu: 0.0.40
codegen_flags: <defaults>
</compile_context>

<pallas_src>
import jax
import jax.numpy as jnp
from jax.experimental import pallas as pl
from jax.experimental.pallas import tpu as pltpu

HIDDEN = 256


def policy_embedding_kernel(x_ref, w1_ref, b1_ref, w2_ref, b2_ref, o_ref):
    # One batch tile: (TB, state_dim) @ (state_dim, 256) -> +b -> ReLU
    #                 -> (TB, 256) @ (256, 256) -> +b -> ReLU.
    x = x_ref[...]

    h1 = jnp.dot(x, w1_ref[...], preferred_element_type=jnp.float32)
    h1 = jnp.maximum(h1 + b1_ref[...], 0.0)              # f32 bias + ReLU (VPU filler)

    h2 = jnp.dot(h1.astype(w2_ref.dtype), w2_ref[...],
                 preferred_element_type=jnp.float32)
    h2 = jnp.maximum(h2 + b2_ref[...], 0.0)

    o_ref[...] = h2.astype(o_ref.dtype)                  # cast only at the final store


def _round_up(x, m):
    return ((x + m - 1) // m) * m


def _choose_batch_tile(B, block_batch, row_multiple, sub_multiple, min_tiles):
    """Pad-aware batch tile selection.

    - Single-tile batches run as one full-array block (no padding, no (8,128) constraint).
    - Otherwise: num_tiles = cdiv(B, block_batch), raised to `min_tiles` when B is large
      enough so a v7x megacore gets >= 2 pipelined steps per core; TB is then sized to
      minimize pad waste, rounded to `row_multiple` (MXU occupancy) or `sub_multiple`
      (sublane packing) for small tiles.
    """
    num_tiles = pl.cdiv(B, block_batch)
    if B >= min_tiles * row_multiple:
        num_tiles = max(num_tiles, min_tiles)
    if num_tiles <= 1:
        return B, 1, B
    tb_raw = pl.cdiv(B, num_tiles)
    mult = row_multiple if tb_raw >= row_multiple else sub_multiple
    TB = _round_up(tb_raw, mult)
    num_tiles = pl.cdiv(B, TB)
    return TB, num_tiles, num_tiles * TB


def policy_embedding(state, w1, b1, w2, b2, *, block_batch=2048, use_bf16=True,
                     out_dtype=jnp.float32, min_tiles=4):
    """state: (B, state_dim). Returns (B, 256) in `out_dtype` (default float32).

    block_batch: max batch rows per grid step (large tiles amortize ~0.35 us/step).
    use_bf16:    cast x / weights to bf16 for the matmuls (MXU is bf16-native on
                 v5e/v6e/v7x); accumulation, bias and ReLU stay f32.
    out_dtype:   jnp.float32 (module-faithful) or jnp.bfloat16 to halve HBM writeback
                 when the consumer accepts bf16.
    min_tiles:   minimum grid length for large batches (>= 4 keeps both v7x cores fed).
    """
    B, state_dim = state.shape
    hidden = w1.shape[1]
    out_dtype = jnp.dtype(out_dtype)

    compute_dtype = jnp.bfloat16 if use_bf16 else jnp.float32
    x = state.astype(compute_dtype)
    w1c = w1.astype(compute_dtype)
    w2c = w2.astype(compute_dtype)
    b1_2d = b1.reshape(1, hidden).astype(jnp.float32)
    b2_2d = b2.reshape(1, hidden).astype(jnp.float32)

    # 16-row sublane multiple whenever a 16-bit tile is in play, else 8.
    any_bf16 = use_bf16 or out_dtype == jnp.dtype(jnp.bfloat16)
    sub_multiple = 16 if any_bf16 else 8
    TB, num_tiles, B_pad = _choose_batch_tile(B, block_batch, 256, sub_multiple, min_tiles)
    if B_pad != B:
        x = jnp.pad(x, ((0, B_pad - B), (0, 0)))

    in_bytes = jnp.dtype(compute_dtype).itemsize
    out_bytes = out_dtype.itemsize
    weight_bytes = (state_dim * hidden + hidden * hidden) * in_bytes + 2 * hidden * 4

    # Advisory cost hint so XLA schedules/overlaps this call well inside a larger graph.
    cost = pl.CostEstimate(
        flops=2 * B_pad * (state_dim * hidden + hidden * hidden),
        transcendentals=0,
        bytes_accessed=B_pad * (state_dim * in_bytes + hidden * out_bytes) + weight_bytes,
    )

    # Scoped-VMEM estimate: double-buffered x/out tiles + resident weights + f32 temps.
    vmem_est = (2 * TB * (state_dim * in_bytes + hidden * out_bytes)
                + 2 * weight_bytes
                + 2 * TB * hidden * 4)
    vmem_limit = None
    if vmem_est > (14 << 20):   # above v5e's 16 MiB scoped default -> raise (cap @ 64 MiB)
        vmem_limit = min(int(vmem_est * 3 // 2), 64 << 20)

    out = pl.pallas_call(
        policy_embedding_kernel,
        out_shape=jax.ShapeDtypeStruct((B_pad, hidden), out_dtype),
        grid=(num_tiles,),
        in_specs=[
            pl.BlockSpec((TB, state_dim), lambda i: (i, 0)),        # x: moves with grid
            pl.BlockSpec((state_dim, hidden), lambda i: (0, 0)),    # w1: resident
            pl.BlockSpec((1, hidden), lambda i: (0, 0)),            # b1: resident
            pl.BlockSpec((hidden, hidden), lambda i: (0, 0)),       # w2: resident
            pl.BlockSpec((1, hidden), lambda i: (0, 0)),            # b2: resident
        ],
        out_specs=pl.BlockSpec((TB, hidden), lambda i: (i, 0)),
        compiler_params=pltpu.CompilerParams(
            # Batch tiles are independent -> shard across TensorCores on v7x megacore.
            dimension_semantics=("parallel",),
            vmem_limit_bytes=vmem_limit,
        ),
        cost_estimate=cost,
    )(x, w1c, b1_2d, w2c, b2_2d)

    if B_pad != B:
        out = out[:B]
    return out


def init_params(key, state_dim):
    """nn.Linear-style init U(-1/sqrt(in), 1/sqrt(in)); weights stored (in, out)."""
    k1, k2, k3, k4 = jax.random.split(key, 4)
    bound1 = 1.0 / jnp.sqrt(jnp.float32(state_dim))
    bound2 = 1.0 / jnp.sqrt(jnp.float32(HIDDEN))
    w1 = jax.random.uniform(k1, (state_dim, HIDDEN), jnp.float32, -bound1, bound1)
    b1 = jax.random.uniform(k2, (HIDDEN,), jnp.float32, -bound1, bound1)
    w2 = jax.random.uniform(k3, (HIDDEN, HIDDEN), jnp.float32, -bound2, bound2)
    b2 = jax.random.uniform(k4, (HIDDEN,), jnp.float32, -bound2, bound2)
    return w1, b1, w2, b2


def _ref(state, w1, b1, w2, b2):
    h = jnp.maximum(state @ w1 + b1, 0.0)
    return jnp.maximum(h @ w2 + b2, 0.0)


if __name__ == "__main__":
    key = jax.random.PRNGKey(0)
    k_params, k_state1, k_state2 = jax.random.split(key, 3)

    state_dim = 8  # LunarLander-style 8-dim observation
    w1, b1, w2, b2 = init_params(k_params, state_dim)

    # Case 1: f32 path, small single-tile batch (tight tolerance).
    state_small = jax.random.normal(k_state1, (8, state_dim), jnp.float32)
    out_small = jax.block_until_ready(
        policy_embedding(state_small, w1, b1, w2, b2, use_bf16=False))
    ref_small = _ref(state_small, w1, b1, w2, b2)
    assert out_small.shape == (8, HIDDEN) and out_small.dtype == jnp.float32
    assert jnp.allclose(out_small, ref_small, atol=1e-5, rtol=1e-5), "mismatch (f32 small)"

    # Case 2: f32 path, multi-tile ragged batch (exercises tiling + pad/slice).
    state_big = jax.random.normal(k_state2, (20, state_dim), jnp.float32)
    ref_big = _ref(state_big, w1, b1, w2, b2)
    out_big = jax.block_until_ready(
        policy_embedding(state_big, w1, b1, w2, b2, block_batch=8, use_bf16=False))
    assert out_big.shape == (20, HIDDEN)
    assert jnp.allclose(out_big, ref_big, atol=1e-5, rtol=1e-5), "mismatch (f32 tiled)"

    # Case 3: default bf16-matmul path (f32 accumulate/bias/ReLU), looser tolerance.
    out_bf16mm = jax.block_until_ready(
        policy_embedding(state_big, w1, b1, w2, b2, block_batch=8))
    assert out_bf16mm.shape == (20, HIDDEN) and out_bf16mm.dtype == jnp.float32
    assert jnp.allclose(out_bf16mm, ref_big, atol=5e-2, rtol=5e-2), "mismatch (bf16 matmul)"

    # Case 4: bf16 output (halves HBM writeback for consumers that accept bf16).
    out_bf16out = jax.block_until_ready(
        policy_embedding(state_big, w1, b1, w2, b2, block_batch=8,
                         out_dtype=jnp.bfloat16))
    assert out_bf16out.shape == (20, HIDDEN) and out_bf16out.dtype == jnp.bfloat16
    assert jnp.allclose(out_bf16out.astype(jnp.float32), ref_big,
                        atol=8e-2, rtol=8e-2), "mismatch (bf16 output)"

    print("KERNEL_OK")
</pallas_src>

<mosaic_0001>
module attributes {stable_mosaic.version = 11 : i64} {
  func.func @policy_embedding_kernel(%arg0: i32, %arg1: memref<8x8xf32, #tpu.memory_space<vmem>>, %arg2: memref<8x256xf32, #tpu.memory_space<vmem>>, %arg3: memref<1x256xf32, #tpu.memory_space<vmem>>, %arg4: memref<256x256xf32, #tpu.memory_space<vmem>>, %arg5: memref<1x256xf32, #tpu.memory_space<vmem>>, %arg6: memref<8x256xf32, #tpu.memory_space<vmem>>) attributes {dimension_semantics = [#tpu.dimension_semantics<parallel>], iteration_bounds = array<i64: 1>, scalar_prefetch = 0 : i64, scratch_operands = 0 : i64, tpu.core_type = #tpu.core_type<tc>, window_params = [{transform_indices = @transform_0, window_bounds = array<i64: 8, 8>}, {pipeline_mode = #tpu.pipeline_mode<synchronous>, transform_indices = @transform_1, window_bounds = array<i64: 8, 256>}, {pipeline_mode = #tpu.pipeline_mode<synchronous>, transform_indices = @transform_2, window_bounds = array<i64: 1, 256>}, {pipeline_mode = #tpu.pipeline_mode<synchronous>, transform_indices = @transform_3, window_bounds = array<i64: 256, 256>}, {pipeline_mode = #tpu.pipeline_mode<synchronous>, transform_indices = @transform_4, window_bounds = array<i64: 1, 256>}, {transform_indices = @transform_5, window_bounds = array<i64: 8, 256>}]} {
    %c0 = arith.constant 0 : index
    %c0_0 = arith.constant 0 : index
    %0 = vector.load %arg1[%c0, %c0_0] : memref<8x8xf32, #tpu.memory_space<vmem>>, vector<8x8xf32>
    %c0_1 = arith.constant 0 : index
    %c0_2 = arith.constant 0 : index
    %1 = vector.load %arg2[%c0_1, %c0_2] : memref<8x256xf32, #tpu.memory_space<vmem>>, vector<8x256xf32>
    %cst = arith.constant dense<0.000000e+00> : vector<8x256xf32>
    %2 = tpu.matmul %0, %1, %cst {dimension_numbers = #tpu.dot_dimension_numbers<[1], [0], [0], [1], [0, 0, 1, 1], [], []>} : vector<8x8xf32>, vector<8x256xf32>, vector<8x256xf32> -> vector<8x256xf32>
    %c0_3 = arith.constant 0 : index
    %c0_4 = arith.constant 0 : index
    %3 = vector.load %arg3[%c0_3, %c0_4] : memref<1x256xf32, #tpu.memory_space<vmem>>, vector<1x256xf32>
    %4 = vector.broadcast %3 : vector<1x256xf32> to vector<8x256xf32>
    %5 = arith.addf %2, %4 : vector<8x256xf32>
    %cst_5 = arith.constant 0.000000e+00 : f32
    %6 = vector.broadcast %cst_5 : f32 to vector<8x256xf32>
    %7 = arith.maximumf %5, %6 : vector<8x256xf32>
    %c0_6 = arith.constant 0 : index
    %c0_7 = arith.constant 0 : index
    %8 = vector.load %arg4[%c0_6, %c0_7] : memref<256x256xf32, #tpu.memory_space<vmem>>, vector<256x256xf32>
    %cst_8 = arith.constant dense<0.000000e+00> : vector<8x256xf32>
    %9 = tpu.matmul %7, %8, %cst_8 {dimension_numbers = #tpu.dot_dimension_numbers<[1], [0], [0], [1], [0, 0, 1, 1], [], []>} : vector<8x256xf32>, vector<256x256xf32>, vector<8x256xf32> -> vector<8x256xf32>
    %c0_9 = arith.constant 0 : index
    %c0_10 = arith.constant 0 : index
    %10 = vector.load %arg5[%c0_9, %c0_10] : memref<1x256xf32, #tpu.memory_space<vmem>>, vector<1x256xf32>
    %11 = vector.broadcast %10 : vector<1x256xf32> to vector<8x256xf32>
    %12 = arith.addf %9, %11 : vector<8x256xf32>
    %cst_11 = arith.constant 0.000000e+00 : f32
    %13 = vector.broadcast %cst_11 : f32 to vector<8x256xf32>
    %14 = arith.maximumf %12, %13 : vector<8x256xf32>
    %c0_12 = arith.constant 0 : index
    %c0_13 = arith.constant 0 : index
    %15 = vector.load %arg6[%c0_12, %c0_13] : memref<8x256xf32, #tpu.memory_space<vmem>>, vector<8x256xf32>
    tpu.vector_store %arg6[%c0_12, %c0_13], %14 {strides = array<i32>} : memref<8x256xf32, #tpu.memory_space<vmem>>, vector<8x256xf32>,
    return
  }
  func.func @transform_0(%arg0: i32) -> (i32, i32) {
    %c0_i32 = arith.constant 0 : i32
    %c0_i32_0 = arith.constant 0 : i32
    return %arg0, %c0_i32 : i32, i32
  }
  func.func @transform_1(%arg0: i32) -> (i32, i32) {
    %c0_i32 = arith.constant 0 : i32
    %c0_i32_0 = arith.constant 0 : i32
    %c0_i32_1 = arith.constant 0 : i32
    return %c0_i32, %c0_i32_0 : i32, i32
  }
  func.func @transform_2(%arg0: i32) -> (i32, i32) {
    %c0_i32 = arith.constant 0 : i32
    %c0_i32_0 = arith.constant 0 : i32
    %c0_i32_1 = arith.constant 0 : i32
    return %c0_i32, %c0_i32_0 : i32, i32
  }
  func.func @transform_3(%arg0: i32) -> (i32, i32) {
    %c0_i32 = arith.constant 0 : i32
    %c0_i32_0 = arith.constant 0 : i32
    %c0_i32_1 = arith.constant 0 : i32
    return %c0_i32, %c0_i32_0 : i32, i32
  }
  func.func @transform_4(%arg0: i32) -> (i32, i32) {
    %c0_i32 = arith.constant 0 : i32
    %c0_i32_0 = arith.constant 0 : i32
    %c0_i32_1 = arith.constant 0 : i32
    return %c0_i32, %c0_i32_0 : i32, i32
  }
  func.func @transform_5(%arg0: i32) -> (i32, i32) {
    %c0_i32 = arith.constant 0 : i32
    %c0_i32_0 = arith.constant 0 : i32
    return %arg0, %c0_i32 : i32, i32
  }
}

</mosaic_0001>

<bundles_post_ra>
// kernel: tpu_custom_call.1
= control target key start
LH: loop header
LB: loop body
LE: loop exit
PB: predicated region body
PF: predicated region fallthrough
CT: control target
= control target key end

     0   :  { %10 = vsyncpa [#allocation3], 0  ;;  %s498_s0 = inlined_call_operand.hbm [shape: f32[8,8], index: 0, kind: input, shape index: {}]   ;;  %s499_s1 = inlined_call_operand.hbm [shape: f32[8,256], index: 1, kind: input, shape index: {}]   ;;  %s500_s2 = inlined_call_operand.hbm [shape: f32[1,256], index: 2, kind: input, shape index: {}]   ;;  %s501_s3 = inlined_call_operand.hbm [shape: f32[256,256], index: 3, kind: input, shape index: {}]   ;;  %s502_s4 = inlined_call_operand.vmem [shape: f32[1,256], index: 4, kind: input, shape index: {}]   ;;  %s503_s5 = inlined_call_operand.hbm [shape: f32[8,256], index: 5, kind: output, shape index: {}]  }
   0x1   :  { %11 = vsyncpa [#allocation6], 0 }
   0x2   :  { %12 = vsyncpa [#allocation9], 0  ;;  %s30_s20 = sshll.u32 %s499_s1, 4  ;;  %s31_s20 = int_to_ptr.hbm [resolvable:$true] %s30_s20 }
   0x3   :  { %13 = vsyncpa [#allocation4], 0  ;;  %s443_s21 = smov [#allocation5]   ;;  %s19_s25 = sshll.u32 %s498_s0, 4  ;;  %s20_s25 = int_to_ptr.hbm [resolvable:$true] %s19_s25 }
   0x4   :  { %s32_s22 = sshll.u32 %s443_s21, 4  ;;  %s444_s26 = smov [#allocation2]   ;;  %s33_s22 = int_to_ptr.vmem [resolvable:$true] %s32_s22 }
   0x5   :  { %35 = dma.hbm_to_vmem [thread:$0]  %s31_s20, 256, %s33_s22, [#allocation6]  }
   0x6   :  { %s21_s27 = sshll.u32 %s444_s26, 4  ;;  %s41_s30 = sshll.u32 %s500_s2, 4  ;;  %s22_s27 = int_to_ptr.vmem [resolvable:$true] %s21_s27  ;;  %s42_s30 = int_to_ptr.hbm [resolvable:$true] %s41_s30 }
   0x7   :  { %24 = dma.hbm_to_vmem [thread:$0]  %s20_s25, 128, %s22_s27, [#allocation3]  }
   0x8   :  { %s51_s7 = sshll.u32 %s501_s3, 4  ;;  %s445_s8 = smov [#allocation7]   ;;  %s52_s7 = int_to_ptr.hbm [resolvable:$true] %s51_s7 }
   0x9   :  { %s43_s9 = sshll.u32 %s445_s8, 4  ;;  %s446_s0 = smov [#allocation8]   ;;  %s44_s9 = int_to_ptr.vmem [resolvable:$true] %s43_s9 }
   0xa   :  { %46 = dma.hbm_to_vmem [thread:$0]  %s42_s30, 32, %s44_s9, [#allocation6]  }
   0xb   :  { %s53_s10 = sshll.u32 %s446_s0, 4  ;;  %s447_s11 = smov 256   ;;  %s54_s10 = int_to_ptr.vmem [resolvable:$true] %s53_s10 }
   0xc   :  { %s448_s12 = smov 16  }
   0xd   :  { %59 = dma.hbm_to_vmem [thread:$0]  %s52_s7, 8192, %s54_s10, [#allocation9], %s447_s11, %s447_s11, %s448_s12  }
   0xe   :  { %435 = dma.done.wait [#allocation3], 128  }
   0xf   :  { %436 = vsyncadd [#allocation3], 4294967168 }
  0x10   :  { %437 = dma.done.wait [#allocation6], 288  }
  0x11   :  { %438 = vsyncadd [#allocation6], 4294967008 }
  0x12   :  { %439 = dma.done.wait [#allocation9], 8192  }
  0x13   :  { %440 = vsyncadd [#allocation9], 4294959104  ;;  %vm87_vm0 = vcmask 64512   ;;  %v79_v0 = vld [vmem:[#allocation5] sm:$0xff]  ;;  %v78_v1 = vld [vmem:[#allocation2] sm:$0xff]  ;;  %s449_s13 = smov [#allocation10]  }
  0x14   :  { %v80_v2 = vld [vmem:[#allocation5 + $0x8] sm:$0xff]  ;;  %106 = vmatpush.msra.mxu0 %v79_v0  ;;  %v161_v5 = vld [vmem:[#allocation8 + $0xe0] sm:$0xff]  ;;  %v162_v7 = vld [vmem:[#allocation8 + $0xe8] sm:$0xff]  ;;  %s292_s14 = sshll.u32 %s449_s13, 4  ;;  %s294_s17 = sshll.u32 %s503_s5, 4  ;;  %s293_s14 = int_to_ptr.vmem [resolvable:$true] %s292_s14  ;;  %s295_s17 = int_to_ptr.hbm [resolvable:$true] %s294_s17 }
  0x15   :  { %126 = vmatpush.msra.mxu1 %v80_v2  ;;  %v163_v3 = vld [vmem:[#allocation8 + $0xf0] sm:$0xff]  ;;  %v164_v4 = vld [vmem:[#allocation8 + $0xf8] sm:$0xff]  ;;  %306 = vmatmul.msk.f32.vlgmr.msra.gmra.mxu0 %vm87_vm0, %v78_v1  ;;  %v193_v9 = vld [vmem:[#allocation8 + $0x1e0] sm:$0xff] }
  0x16   :  { %307 = vmatmul.msk.f32.vlgmr.msra.gmra.mxu1 %vm87_vm0, %v78_v1  ;;  %v195_v6 = vld [vmem:[#allocation8 + $0x1f0] sm:$0xff]  ;;  %v196_v8 = vld [vmem:[#allocation8 + $0x1f8] sm:$0xff]  ;;  %203 = vmatpush.msra.mxu2 %v163_v3  ;;  %v194_v12 = vld [vmem:[#allocation8 + $0x1e8] sm:$0xff] }
  0x17   :  { %243 = vmatpush.msrb.mxu0 %v164_v4  ;;  %223 = vmatpush.msra.mxu3 %v195_v6  ;;  %v159_v10 = vld [vmem:[#allocation8 + $0xd0] sm:$0xff]  ;;  %v160_v11 = vld [vmem:[#allocation8 + $0xd8] sm:$0xff]  ;;  %v157_v15 = vld [vmem:[#allocation8 + $0xc0] sm:$0xff] }
  0x18   :  { %263 = vmatpush.msrb.mxu1 %v196_v8  ;;  %204 = vmatpush.msra.mxu2 %v161_v5  ;;  %v191_v13 = vld [vmem:[#allocation8 + $0x1d0] sm:$0xff]  ;;  %v192_v14 = vld [vmem:[#allocation8 + $0x1d8] sm:$0xff]  ;;  %v158_v16 = vld [vmem:[#allocation8 + $0xc8] sm:$0xff] }
  0x19   :  { %244 = vmatpush.msrb.mxu0 %v162_v7  ;;  %224 = vmatpush.msra.mxu3 %v193_v9  ;;  %v189_v17 = vld [vmem:[#allocation8 + $0x1c0] sm:$0xff]  ;;  %v190_v18 = vld [vmem:[#allocation8 + $0x1c8] sm:$0xff]  ;;  %v155_v19 = vld [vmem:[#allocation8 + $0xb0] sm:$0xff] }
  0x1a   :  { %264 = vmatpush.msrb.mxu1 %v194_v12  ;;  %205 = vmatpush.msra.mxu2 %v159_v10  ;;  %v156_v20 = vld [vmem:[#allocation8 + $0xb8] sm:$0xff]  ;;  %v187_v21 = vld [vmem:[#allocation8 + $0x1b0] sm:$0xff]  ;;  %v153_v23 = vld [vmem:[#allocation8 + $0xa0] sm:$0xff] }
  0x1b   :  { %245 = vmatpush.msrb.mxu0 %v160_v11  ;;  %225 = vmatpush.msra.mxu3 %v191_v13  ;;  %v188_v22 = vld [vmem:[#allocation8 + $0x1b8] sm:$0xff]  ;;  %v154_v24 = vld [vmem:[#allocation8 + $0xa8] sm:$0xff]  ;;  %v185_v25 = vld [vmem:[#allocation8 + $0x1a0] sm:$0xff] }
  0x1c   :  { %265 = vmatpush.msrb.mxu1 %v192_v14  ;;  %206 = vmatpush.msra.mxu2 %v157_v15  ;;  %v186_v26 = vld [vmem:[#allocation8 + $0x1a8] sm:$0xff]  ;;  %v151_v27 = vld [vmem:[#allocation8 + $0x90] sm:$0xff]  ;;  %v152_v28 = vld [vmem:[#allocation8 + $0x98] sm:$0xff] }
  0x1d   :  { %246 = vmatpush.msrb.mxu0 %v158_v16  ;;  %226 = vmatpush.msra.mxu3 %v189_v17  ;;  %v183_v29 = vld [vmem:[#allocation8 + $0x190] sm:$0xff]  ;;  %v184_v30 = vld [vmem:[#allocation8 + $0x198] sm:$0xff]  ;;  %v149_v31 = vld [vmem:[#allocation8 + $0x80] sm:$0xff] }
  0x1e   :  { %266 = vmatpush.msrb.mxu1 %v190_v18  ;;  %207 = vmatpush.msra.mxu2 %v155_v19  ;;  %v150_v32 = vld [vmem:[#allocation8 + $0x88] sm:$0xff]  ;;  %v181_v33 = vld [vmem:[#allocation8 + $0x180] sm:$0xff]  ;;  %v147_v35 = vld [vmem:[#allocation8 + $0x70] sm:$0xff] }
  0x1f   :  { %247 = vmatpush.msrb.mxu0 %v156_v20  ;;  %227 = vmatpush.msra.mxu3 %v187_v21  ;;  %v182_v34 = vld [vmem:[#allocation8 + $0x188] sm:$0xff]  ;;  %v148_v36 = vld [vmem:[#allocation8 + $0x78] sm:$0xff]  ;;  %v179_v37 = vld [vmem:[#allocation8 + $0x170] sm:$0xff] }
  0x20   :  { %267 = vmatpush.msrb.mxu1 %v188_v22  ;;  %208 = vmatpush.msra.mxu2 %v153_v23  ;;  %v180_v38 = vld [vmem:[#allocation8 + $0x178] sm:$0xff]  ;;  %v145_v39 = vld [vmem:[#allocation8 + $0x60] sm:$0xff]  ;;  %v146_v40 = vld [vmem:[#allocation8 + $0x68] sm:$0xff] }
  0x21   :  { %248 = vmatpush.msrb.mxu0 %v154_v24  ;;  %228 = vmatpush.msra.mxu3 %v185_v25  ;;  %v177_v41 = vld [vmem:[#allocation8 + $0x160] sm:$0xff]  ;;  %v178_v42 = vld [vmem:[#allocation8 + $0x168] sm:$0xff]  ;;  %v143_v43 = vld [vmem:[#allocation8 + $0x50] sm:$0xff] }
  0x22   :  { %268 = vmatpush.msrb.mxu1 %v186_v26  ;;  %209 = vmatpush.msra.mxu2 %v151_v27  ;;  %v144_v44 = vld [vmem:[#allocation8 + $0x58] sm:$0xff]  ;;  %v175_v45 = vld [vmem:[#allocation8 + $0x150] sm:$0xff]  ;;  %v141_v47 = vld [vmem:[#allocation8 + $0x40] sm:$0xff] }
  0x23   :  { %249 = vmatpush.msrb.mxu0 %v152_v28  ;;  %229 = vmatpush.msra.mxu3 %v183_v29  ;;  %v176_v46 = vld [vmem:[#allocation8 + $0x158] sm:$0xff]  ;;  %v142_v48 = vld [vmem:[#allocation8 + $0x48] sm:$0xff]  ;;  %v173_v49 = vld [vmem:[#allocation8 + $0x140] sm:$0xff] }
  0x24   :  { %269 = vmatpush.msrb.mxu1 %v184_v30  ;;  %210 = vmatpush.msra.mxu2 %v149_v31  ;;  %v174_v50 = vld [vmem:[#allocation8 + $0x148] sm:$0xff]  ;;  %v139_v51 = vld [vmem:[#allocation8 + $0x30] sm:$0xff]  ;;  %v140_v52 = vld [vmem:[#allocation8 + $0x38] sm:$0xff] }
  0x25   :  { %250 = vmatpush.msrb.mxu0 %v150_v32  ;;  %230 = vmatpush.msra.mxu3 %v181_v33  ;;  %v137_v53 = vld [vmem:[#allocation8 + $0x20] sm:$0xff]  ;;  %v171_v54 = vld [vmem:[#allocation8 + $0x130] sm:$0xff]  ;;  %v138_v55 = vld [vmem:[#allocation8 + $0x28] sm:$0xff] }
  0x26   :  { %270 = vmatpush.msrb.mxu1 %v182_v34  ;;  %211 = vmatpush.msra.mxu2 %v147_v35  ;;  %v172_v56 = vld [vmem:[#allocation8 + $0x138] sm:$0xff]  ;;  %v135_v57 = vld [vmem:[#allocation8 + $0x10] sm:$0xff]  ;;  %v169_v58 = vld [vmem:[#allocation8 + $0x120] sm:$0xff] }
  0x27   :  { %251 = vmatpush.msrb.mxu0 %v148_v36  ;;  %231 = vmatpush.msra.mxu3 %v179_v37  ;;  %v136_v59 = vld [vmem:[#allocation8 + $0x18] sm:$0xff]  ;;  %v170_v60 = vld [vmem:[#allocation8 + $0x128] sm:$0xff]  ;;  %v133_v61 = vld [vmem:[#allocation8] sm:$0xff] }
  0x28   :  { %271 = vmatpush.msrb.mxu1 %v180_v38  ;;  %212 = vmatpush.msra.mxu2 %v145_v39  ;;  %v167_v62 = vld [vmem:[#allocation8 + $0x110] sm:$0xff]  ;;  %v134_v63 = vld [vmem:[#allocation8 + $0x8] sm:$0xff]  ;;  %v168_v0 = vld [vmem:[#allocation8 + $0x118] sm:$0xff] }
  0x29   :  { %252 = vmatpush.msrb.mxu0 %v146_v40  ;;  %232 = vmatpush.msra.mxu3 %v177_v41  ;;  %v165_v1 = vld [vmem:[#allocation8 + $0x100] sm:$0xff]  ;;  %v166_v2 = vld [vmem:[#allocation8 + $0x108] sm:$0xff]  ;;  %v81_v3 = vld [vmem:[#allocation7] sm:$0x3] }
  0x2a   :  { %272 = vmatpush.msrb.mxu1 %v178_v42  ;;  %213 = vmatpush.msra.mxu2 %v143_v43  ;;  %v83_v4 = vperm.slane %v81_v3, 0  ;;  %v84_v5 = vperm.slane %v81_v3, 1  ;;  %v197_v12 = vld [vmem:[%s502_s4] sm:$0x3] }
  0x2b   :  { %253 = vmatpush.msrb.mxu0 %v144_v44  ;;  %233 = vmatpush.msra.mxu3 %v175_v45  ;;  %v200_v13 = vperm.slane %v197_v12, 1  ;;  %v199_v18 = vperm.slane %v197_v12, 0 }
  0x2c   :  { %273 = vmatpush.msrb.mxu1 %v176_v46  ;;  %214 = vmatpush.msra.mxu2 %v141_v47 }
  0x2d   :  { %254 = vmatpush.msrb.mxu0 %v142_v48  ;;  %234 = vmatpush.msra.mxu3 %v173_v49 }
  0x2e   :  { %274 = vmatpush.msrb.mxu1 %v174_v50  ;;  %215 = vmatpush.msra.mxu2 %v139_v51 }
  0x2f   :  { %255 = vmatpush.msrb.mxu0 %v140_v52  ;;  %235 = vmatpush.msra.mxu3 %v171_v54 }
  0x30   :  { %216 = vmatpush.msra.mxu2 %v137_v53  ;;  %275 = vmatpush.msrb.mxu1 %v172_v56 }
  0x31   :  { %256 = vmatpush.msrb.mxu0 %v138_v55  ;;  %236 = vmatpush.msra.mxu3 %v169_v58 }
  0x32   :  { %217 = vmatpush.msra.mxu2 %v135_v57  ;;  %276 = vmatpush.msrb.mxu1 %v170_v60 }
  0x33   :  { %257 = vmatpush.msrb.mxu0 %v136_v59  ;;  %237 = vmatpush.msra.mxu3 %v167_v62 }
  0x34   :  { %218 = vmatpush.msra.mxu2 %v133_v61  ;;  %277 = vmatpush.msrb.mxu1 %v168_v0 }
  0x35   :  { %258 = vmatpush.msrb.mxu0 %v134_v63  ;;  %238 = vmatpush.msra.mxu3 %v165_v1 }
  0x36   :  { %278 = vmatpush.msrb.mxu1 %v166_v2 }
  0x92   :  { %v108_v6 = vpop.f32.mrf.mxu0 }
  0x93   :  { %v128_v7 = vpop.f32.mrf.mxu1  ;;  %v109_v8 = vadd.f32 %v108_v6, %v83_v4 }
  0x94   :  { %v129_v9 = vadd.f32 %v128_v7, %v84_v5 }
  0x95   :  { %v131_v10 = vmax.f32 %v109_v8, 0.0 }
  0x96   :  { %v132_v11 = vmax.f32 %v129_v9, 0.0 }
  0x97   :  { %219 = vmatmul.f32.vlgmr.msra.gmra.mxu2 %v131_v10  ;;  %259 = vmatmul.f32.vlgmr.msrb.gmra.mxu0 %v131_v10 }
  0x98   :  { %239 = vmatmul.f32.vlgmr.msra.gmra.mxu3 %v132_v11  ;;  %279 = vmatmul.f32.vlgmr.msrb.gmra.mxu1 %v132_v11 }
 0x114   :  { %v260_v14 = vpop.f32.mrf.mxu0 }
 0x115   :  { %v261_v15 = vadd.f32 %v260_v14, %v200_v13  ;;  %v280_v16 = vpop.f32.mrf.mxu1 }
 0x117   :  { %v281_v17 = vadd.f32 %v280_v16, %v261_v15 }
 0x119   :  { %v284_v19 = vmax.f32 %v281_v17, 0.0 }
 0x11a   :  { %v220_v20 = vpop.f32.mrf.mxu2 }
 0x11b   :  { %286 = vst [vmem:[#allocation10 + $0x8] sm:$0xff] %v284_v19  ;;  %v221_v21 = vadd.f32 %v220_v20, %v199_v18  ;;  %v240_v22 = vpop.f32.mrf.mxu3 }
 0x11d   :  { %v241_v23 = vadd.f32 %v240_v22, %v221_v21 }
 0x11f   :  { %v283_v24 = vmax.f32 %v241_v23, 0.0 }
 0x121   :  { %285 = vst [vmem:[#allocation10] sm:$0xff] %v283_v24 }
 0x122   :  { %297 = dma.vmem_to_hbm [thread:$0]  %s293_s14, 256, %s295_s17, [#allocation4]  }
 0x123   :  { %441 = dma.done.wait [#allocation4], 256  }
 0x124   :  { %442 = vsyncadd [#allocation4], 4294967040 }
 0x125   :  { %302 = vsyncpa [#allocation3], 1 }
 0x126   :  { %303 = vsyncpa [#allocation6], 1 }
 0x127   :  { %304 = vsyncpa [#allocation9], 1 }
 0x128   :  { %305 = vsyncpa [#allocation4], 1 }

</bundles_post_ra>
